<compile_context>
chip_gen: v7x
topology: tpu7x:2x2x1
jax: 0.10.0
libtpu: 0.0.40
codegen_flags: <defaults>
</compile_context>

<pallas_src>
import jax
import jax.numpy as jnp
from jax import lax
from jax.experimental import pallas as pl
from jax.experimental.pallas import tpu as pltpu


def _round_up(x, m):
    return (x + m - 1) // m * m


def _down_sample_kernel(w_ref, b_ref, p_ref, o_ref):
    # w_ref: [Cout, K], b_ref: [Cout, 1] (f32), p_ref: [1, K, TM],
    # o_ref: [1, Cout, TM]
    acc = jnp.dot(w_ref[...], p_ref[0], preferred_element_type=jnp.float32)
    o_ref[0] = (acc + b_ref[...]).astype(o_ref.dtype)


def down_sample_pallas(x, weight, bias, *, max_tile_m=1024, compute_dtype=None):
    """x: [B, Cin, H, W] (NCHW). weight: [Cout, Cin, 2, 2]. bias: [Cout].
    Returns [B, Cout, H//2, W//2] matching nn.Conv2d(k=2, s=2, p=0).

    compute_dtype: optionally cast streamed operands (e.g. jnp.bfloat16 on
    v6e/v7x) -- accumulation stays f32 on the MXU either way."""
    B, Cin, H, W = x.shape
    Cout = weight.shape[0]
    OH, OW = H // 2, W // 2
    # Conv2d(k=2, s=2, p=0) floors odd spatial dims: drop last row/col.
    x = x[:, :, : 2 * OH, : 2 * OW]

    K = Cin * 4
    Mp = OH * OW

    # M tile: lane-dense (multiple of 128), small enough for v7x's 64 MiB VMEM
    # with 2-deep input/output buffering (K*TM*4B per buffer is <= 256 KiB for
    # K up to 1024).
    TM = min(max_tile_m, _round_up(Mp, 128))
    M_pad = _round_up(Mp, TM)
    num_m = M_pad // TM

    cdt = x.dtype if compute_dtype is None else compute_dtype

    # Patch extraction: [B, Cin, OH, 2, OW, 2] -> [B, Cin, 2, 2, OH, OW]
    # -> [B, K, M'].  K ordering (cin, kh, kw) matches weight.reshape(Cout, K).
    patches = x.reshape(B, Cin, OH, 2, OW, 2)
    patches = jnp.transpose(patches, (0, 1, 3, 5, 2, 4)).reshape(B, K, Mp)
    patches = patches.astype(cdt)
    if M_pad != Mp:
        patches = jnp.pad(patches, ((0, 0), (0, 0), (0, M_pad - Mp)))

    w_mat = weight.reshape(Cout, K).astype(cdt)          # [Cout, K]
    b_mat = bias.reshape(Cout, 1).astype(jnp.float32)    # [Cout, 1]

    in_bytes = jnp.dtype(cdt).itemsize
    out_bytes = jnp.dtype(x.dtype).itemsize
    cost = pl.CostEstimate(
        flops=2 * B * Mp * K * Cout,
        transcendentals=0,
        bytes_accessed=(in_bytes * (B * K * Mp + K * Cout)
                        + out_bytes * B * Cout * Mp
                        + 4 * Cout),
    )

    out_p = pl.pallas_call(
        _down_sample_kernel,
        out_shape=jax.ShapeDtypeStruct((B, Cout, M_pad), x.dtype),
        grid_spec=pltpu.PrefetchScalarGridSpec(
            num_scalar_prefetch=0,
            grid=(B, num_m),
            in_specs=[
                pl.BlockSpec((Cout, K), lambda b, m: (0, 0)),   # resident weight
                pl.BlockSpec((Cout, 1), lambda b, m: (0, 0)),   # resident bias
                pl.BlockSpec((1, K, TM), lambda b, m: (b, 0, m)),
            ],
            out_specs=pl.BlockSpec((1, Cout, TM), lambda b, m: (b, 0, m)),
        ),
        compiler_params=pltpu.CompilerParams(
            dimension_semantics=("parallel", "parallel")),
        cost_estimate=cost,
    )(w_mat, b_mat, patches)

    # [B, Cout, M'] -> [B, Cout, OH, OW]  (reshape only; no transpose)
    return out_p[:, :, :Mp].reshape(B, Cout, OH, OW)


def _reference_conv(x, weight, bias):
    Cout = weight.shape[0]
    return lax.conv_general_dilated(
        x, weight, window_strides=(2, 2), padding="VALID",
        dimension_numbers=("NCHW", "OIHW", "NCHW"),
    ) + bias.reshape(1, Cout, 1, 1)


if __name__ == "__main__":
    key = jax.random.PRNGKey(0)
    k_x, k_w, k_b, k_x2 = jax.random.split(key, 4)

    B, Cin, H, W = 2, 4, 16, 16
    Cout = Cin * 2

    x = jax.random.normal(k_x, (B, Cin, H, W), dtype=jnp.float32)
    weight = jax.random.normal(k_w, (Cout, Cin, 2, 2), dtype=jnp.float32) * 0.1
    bias = jax.random.normal(k_b, (Cout,), dtype=jnp.float32) * 0.1

    out = jax.block_until_ready(down_sample_pallas(x, weight, bias))
    ref = _reference_conv(x, weight, bias)

    assert out.shape == (B, Cout, H // 2, W // 2), out.shape
    assert jnp.allclose(out, ref, atol=1e-4, rtol=1e-4), "mismatch vs reference conv"

    # Odd spatial dims (floor behavior of Conv2d k=2, s=2, p=0).
    x_odd = jax.random.normal(k_x2, (B, Cin, 17, 15), dtype=jnp.float32)
    out_odd = jax.block_until_ready(down_sample_pallas(x_odd, weight, bias))
    ref_odd = _reference_conv(x_odd, weight, bias)
    assert out_odd.shape == (B, Cout, 8, 7), out_odd.shape
    assert jnp.allclose(out_odd, ref_odd, atol=1e-4, rtol=1e-4), "odd-size mismatch"

    print("KERNEL_OK")
</pallas_src>

<mosaic_0001>
module attributes {stable_mosaic.version = 11 : i64} {
  func.func @_down_sample_kernel(%arg0: i32, %arg1: i32, %arg2: memref<8x16xf32, #tpu.memory_space<vmem>>, %arg3: memref<8x1xf32, #tpu.memory_space<vmem>>, %arg4: memref<1x16x128xf32, #tpu.memory_space<vmem>>, %arg5: memref<1x8x128xf32, #tpu.memory_space<vmem>>) attributes {dimension_semantics = [#tpu.dimension_semantics<parallel>, #tpu.dimension_semantics<parallel>], iteration_bounds = array<i64: 2, 1>, scalar_prefetch = 0 : i64, scratch_operands = 0 : i64, tpu.core_type = #tpu.core_type<tc>, window_params = [{pipeline_mode = #tpu.pipeline_mode<synchronous>, transform_indices = @transform_0, window_bounds = array<i64: 8, 16>}, {pipeline_mode = #tpu.pipeline_mode<synchronous>, transform_indices = @transform_1, window_bounds = array<i64: 8, 1>}, {transform_indices = @transform_2, window_bounds = array<i64: 1, 16, 128>}, {transform_indices = @transform_3, window_bounds = array<i64: 1, 8, 128>}]} {
    %c0 = arith.constant 0 : index
    %c0_0 = arith.constant 0 : index
    %0 = vector.load %arg2[%c0, %c0_0] : memref<8x16xf32, #tpu.memory_space<vmem>>, vector<8x16xf32>
    %c0_1 = arith.constant 0 : index
    %c0_2 = arith.constant 0 : index
    %c0_3 = arith.constant 0 : index
    %1 = vector.load %arg4[%c0_1, %c0_2, %c0_3] : memref<1x16x128xf32, #tpu.memory_space<vmem>>, vector<1x16x128xf32>
    %2 = vector.shape_cast %1 : vector<1x16x128xf32> to vector<16x128xf32>
    %cst = arith.constant dense<0.000000e+00> : vector<8x128xf32>
    %3 = tpu.matmul %0, %2, %cst {dimension_numbers = #tpu.dot_dimension_numbers<[1], [0], [0], [1], [0, 0, 1, 1], [], []>} : vector<8x16xf32>, vector<16x128xf32>, vector<8x128xf32> -> vector<8x128xf32>
    %c0_4 = arith.constant 0 : index
    %c0_5 = arith.constant 0 : index
    %4 = vector.load %arg3[%c0_4, %c0_5] : memref<8x1xf32, #tpu.memory_space<vmem>>, vector<8x1xf32>
    %5 = vector.broadcast %4 : vector<8x1xf32> to vector<8x128xf32>
    %6 = arith.addf %3, %5 : vector<8x128xf32>
    %c0_6 = arith.constant 0 : index
    %c0_7 = arith.constant 0 : index
    %c0_8 = arith.constant 0 : index
    %7 = vector.load %arg5[%c0_6, %c0_7, %c0_8] : memref<1x8x128xf32, #tpu.memory_space<vmem>>, vector<1x8x128xf32>
    %8 = vector.shape_cast %7 : vector<1x8x128xf32> to vector<8x128xf32>
    %9 = vector.shape_cast %6 : vector<8x128xf32> to vector<1x8x128xf32>
    tpu.vector_store %arg5[%c0_6, %c0_7, %c0_8], %9 {strides = array<i32>} : memref<1x8x128xf32, #tpu.memory_space<vmem>>, vector<1x8x128xf32>,
    return
  }
  func.func @transform_0(%arg0: i32, %arg1: i32) -> (i32, i32) {
    %c0_i32 = arith.constant 0 : i32
    %c0_i32_0 = arith.constant 0 : i32
    %c0_i32_1 = arith.constant 0 : i32
    return %c0_i32, %c0_i32_0 : i32, i32
  }
  func.func @transform_1(%arg0: i32, %arg1: i32) -> (i32, i32) {
    %c0_i32 = arith.constant 0 : i32
    %c0_i32_0 = arith.constant 0 : i32
    %c0_i32_1 = arith.constant 0 : i32
    return %c0_i32, %c0_i32_0 : i32, i32
  }
  func.func @transform_2(%arg0: i32, %arg1: i32) -> (i32, i32, i32) {
    %c0_i32 = arith.constant 0 : i32
    %c0_i32_0 = arith.constant 0 : i32
    return %arg0, %c0_i32, %arg1 : i32, i32, i32
  }
  func.func @transform_3(%arg0: i32, %arg1: i32) -> (i32, i32, i32) {
    %c0_i32 = arith.constant 0 : i32
    %c0_i32_0 = arith.constant 0 : i32
    return %arg0, %c0_i32, %arg1 : i32, i32, i32
  }
}

</mosaic_0001>

<bundles_post_ra>
// kernel: tpu_custom_call.1
= control target key start
LH: loop header
LB: loop body
LE: loop exit
PB: predicated region body
PF: predicated region fallthrough
CT: control target
= control target key end

     0   :  { %8 = vsyncpa [#allocation3], 0  ;;  %s806_s0 = inlined_call_operand.vmem [shape: f32[8,16], index: 0, kind: input, shape index: {}]   ;;  %s807_s1 = inlined_call_operand.vmem [shape: f32[8,1], index: 1, kind: input, shape index: {}]   ;;  %s808_s2 = inlined_call_operand.hbm [shape: f32[2,16,128], index: 2, kind: input, shape index: {}]   ;;  %s809_s3 = inlined_call_operand.hbm [shape: f32[2,8,128], index: 3, kind: output, shape index: {}]  }
   0x1   :  { %10 = vsyncpa [#allocation3 + $0x1], 0 }
   0x2   :  { %11 = vsyncpa [#allocation4], 0 }
   0x3   :  { %13 = vsyncpa [#allocation4 + $0x1], 0  ;;  %s626_s12 = smov 0   ;;  %s628_s13 = smov 0  }
   0x4   :  { %s630_s14 = smov 0   ;;  %s632_s15 = smov 0  }
   0x5   :  { %s634_s16 = smov 0   ;;  %s636_s17 = smov 0  }
   0x6 LB: > { %s386_s18 = sadd.s32 4294967295, %s596_s17   ;;  %s387_s19 = sadd.s32 4294967294, %s596_s17   ;;  %s596_s17 = sphi %s636_s17, %s19_s17   ;;  %s592_s16 = sphi %s634_s16, %s824_s16   ;;  %s588_s15 = sphi %s632_s15, %s823_s15   ;;  %s584_s14 = sphi %s630_s14, %s822_s14   ;;  %s580_s13 = sphi %s628_s13, %s821_s13   ;;  %s576_s12 = sphi %s626_s12, %s820_s12  }
   0x7   : > { %s31_s20 = sadd.s32 1, %s592_s16  ;;  %s82_s21 = sadd.s32 1, %s584_s14 }
   0x8   : > { %p33_p0 = scmp.ge.s32.totalorder %s31_s20, 2  ;;  %p89_p1 = scmp.ne.s32.totalorder %s584_s14, %s580_s13 }
   0x9   : > { %p90_p2 = scmp.eq.s32.totalorder %s596_s17, 0  ;;  %p95_p3 = scmp.ne.s32.totalorder %s580_s13, %s576_s12 }
   0xa   : > { %s826_s20 = smov (%p33_p0, %s31_s20), 0  ;;  %p96_p5 = scmp.eq.s32.totalorder %s386_s18, 0 }
   0xb   : > { %p667_p4 = por %p90_p2, %p89_p1  ;;  %s77_s23 = ssub.s32 %s592_s16, %s826_s20 }
   0xc   : > { %p121_p6 = scmp.eq.s32.totalorder %s386_s18, 1  ;;  %p80_p7 = scmp.eq.s32.totalorder %s77_s23, 0 }
   0xd   : > { %p673_p8 = por %p96_p5, %p95_p3  ;;  %p127_p10 = scmp.eq.s32.totalorder %s387_s19, 1 }
   0xe   : > { %p677_p9 = por %p121_p6, %p89_p1  ;;  %p427_p13 = scmp.lt.s32.totalorder %s596_s17, 2 }
   0xf   : > { %s682_s26 = scalar_select %p80_p7, %s584_s14, %s82_s21  }
  0x10   : > { %s813_s25 = scalar_select %p677_p9, 1, 0 }
  0x11   : > { %p684_p11 = por %p127_p10, %p95_p3  ;;  %s153_s28 = sand.u32 1, %s584_s14  }
  0x12   : > { %s390_s29 = sshll.u32 %s153_s28, 4  ;;  %s401_s30 = sshll.u32 %s592_s16, 8 }
  0x13   : > { %s814_s27 = scalar_select %p684_p11, 1, 0 }
  0x14   : > { %s695_s6 = scalar_lea.hbm %s808_s2, %s401_s30  ;;  %s157_s7 = scalar_lea.vmem [#allocation2], %s390_s29 }
  0x15   : > { %s165_s8 = sshll.u32 %s157_s7, 4  ;;  %p701_p0 = pnand %p427_p13, %p667_p4  ;;  %s697_s8 = int_to_ptr.vmem [resolvable:$true] %s165_s8 }
  0x16   : > { %s706_s10 = scalar_lea.sflag [#allocation3], %s153_s28  ;;  %s484_s11 = scalar_lea.hbm %s695_s6, 256 }
  0x17   : > { %p485_p2 = scmp.ne.s32.totalorder %s695_s6, %s484_s11  ;;  %p486_p3 = pneg %p701_p0 }
  0x18   : > { %s489_s21 = scalar_lea.hbm %s808_s2, 512  ;;  %p490_p4 = scmp.lt.u32.totalorder %s695_s6, %s808_s2 }
  0x19   : > { %p487_p5 = pnand %p486_p3, %p485_p2  ;;  %p491_p7 = scmp.lt.u32.totalorder %s489_s21, %s484_s11 }
  0x1a   : > { %p493_p13 = scmp.lt.u32.totalorder %s484_s11, %s695_s6 }
  0x1b   : > { %p488_p6 = pneg %p487_p5  ;;  %p492_p10 = por %p491_p7, %p490_p4 }
  0x1d   : > { %p494_p12 = por %p493_p13, %p492_p10 }
  0x1f   : > { %p495_p1 = pnand %p494_p12, %p488_p6 }
  0x21   : > { %498 = shalt.err (!%p495_p1)
}
  0x22   : > { %s499_s28 = scalar_lea.vmem %s697_s8, 256  ;;  %s598_s29 = smov [#allocation2]  }
  0x23   : > { %p500_p2 = scmp.ne.s32.totalorder %s697_s8, %s499_s28  ;;  %s504_s30 = sshll.u32 %s598_s29, 4  ;;  %s505_s30 = int_to_ptr.vmem [resolvable:$false] %s504_s30 }
  0x24   : > { %s506_s4 = scalar_lea.vmem %s505_s30, 512  ;;  %p507_p9 = scmp.lt.s32.totalorder %s697_s8, %s505_s30 }
  0x25   : > { %p502_p5 = pnand %p500_p2, %p486_p3  ;;  %p508_p4 = scmp.lt.s32.totalorder %s506_s4, %s499_s28 }
  0x27   : > { %p503_p11 = pneg %p502_p5  ;;  %p509_p7 = por %p508_p4, %p507_p9 }
  0x29   : > { %p510_p10 = pnand %p509_p7, %p503_p11 }
  0x2b   : > { %513 = shalt.err (!%p510_p10)
}
  0x2c   : > { %s599_s5 = smov 128   ;;  %s600_s7 = smov 8  }
  0x2d   : > { %422 = dma.hbm_to_vmem [thread:$0]  (!%p701_p0), %s695_s6, 256, %s697_s8, %s706_s10, %s599_s5, %s599_s5, %s600_s7  }
  0x2e   : > { %p173_p12 = scmp.lt.s32.totalorder %s596_s17, 3  ;;  %p816_p1 = scmp.ge.s32.totalorder %s596_s17, 1 }
  0x30   : > { %p174_p3 = pnand %p816_p1, %p173_p12 }
  0x31   : > { %s738_s11 = sand.u32 (!%p174_p3), 1, %s580_s13  }
  0x32   : > { %177 = sbr.rel (%p174_p3) target bundleno = 293 (0x125), region = 32  ;;  %s394_s18 = sshll.u32 (!%p174_p3), %s738_s11, 4 }
  0x33   : > { %s180_s19 = scalar_lea.sflag (!%p174_p3), [#allocation3], %s738_s11  ;;  %s183_s21 = scalar_lea.vmem (!%p174_p3), [#allocation2], %s394_s18 }
  0x39   : > { %567 = dma.done.wait (%p673_p8), %s180_s19, 256  }
  0x3a   : > { %569 = vsyncadd (%p673_p8), %s180_s19, 4294967040  ;;  %v601_v0 = vmov 0.0|0.0   ;;  %vm602_vm0 = vmmov 0   ;;  %v603_v1 = vmov 0.0   ;;  %v604_v2 = vmov 0   ;;  %v207_v3 = vld [vmem:[%s183_s21] sm:$0xff] }
  0x3b   : > { %412 = vmatprep.subr.bf16.mxu0 %v601_v0  ;;  %409 = vmatprep.mubr.msk.f32.mxu0 %vm602_vm0, %v603_v1  ;;  %v208_v4 = vld [vmem:[%s183_s21 + $0x8] sm:$0xff]  ;;  %v209_v6 = vld [vmem:[%s807_s1] sm:$0xff]  ;;  %vm215_vm1 = vcmask 130048   ;;  %s395_s10 = sshll.u32 %s738_s11, 3  ;;  %s398_s22 = sshll.u32 %s588_s15, 7 }
  0x3c   : > { %483 = vset.pattern.permute.xlu0 %v604_v2  ;;  %v413_v5 = vpack.c.bf16 %v208_v4, %v207_v3  ;;  %v206_v7 = vld [vmem:[%s806_s0] sm:$0xff]  ;;  %s205_s23 = scalar_lea.vmem [#allocation5], %s395_s10  ;;  %s757_s4 = scalar_lea.hbm %s809_s3, %s398_s22 }
  0x3d   : > { %212 = vperm.xlu0 %483, %v209_v6   ;;  %s305_s28 = sshll.u32 %s205_s23, 4  ;;  %s291_s5 = scalar_lea.sflag [#allocation4], %s738_s11  ;;  %s759_s28 = int_to_ptr.vmem [resolvable:$true] %s305_s28 }
  0x3e   : > { %414 = vmatpush3.bf16.msra.mxu0 %v413_v5  ;;  %s514_s7 = scalar_lea.vmem %s759_s28, 128  ;;  %p817_p9 = scmp.ne.s32.totalorder %s813_s25, 0 }
  0x3f   : > { %p515_p8 = scmp.ne.s32.totalorder %s759_s28, %s514_s7  ;;  %s605_s15 = smov [#allocation5]  }
  0x40   : > { %s518_s18 = sshll.u32 %s605_s15, 4  ;;  %s519_s18 = int_to_ptr.vmem [resolvable:$false] %s518_s18 }
  0x41   : > { %410 = vmatmul.mubr.msk.f32.vlgmr.msra.gmra.mrb[0].mxu0 %vm215_vm1, %v206_v7  ;;  %p516_p11 = pnand %p515_p8, %p817_p9  ;;  %s520_s19 = scalar_lea.vmem %s519_s18, 256 }
  0x42   : > { %p521_p6 = scmp.lt.s32.totalorder %s759_s28, %s519_s18  ;;  %p522_p13 = scmp.lt.s32.totalorder %s520_s19, %s514_s7 }
  0x43   : > { %p517_p0 = pneg %p516_p11 }
  0x44   : > { %p523_p2 = por %p522_p13, %p521_p6 }
  0x46   : > { %p524_p5 = pnand %p523_p2, %p517_p0 }
  0xbc   : > { %v213_v8 = vpop.permute.xlu0 %212 }
 0x114   : > { %v285_v9 = vpop.f32.mrb[0].mxu0 }
 0x115   : > { %v286_v10 = vadd.f32 %v285_v9, %v213_v8  ;;  %v411_v11 = vpop.f32.mrb[1].mxu0 }
 0x117   : > { %289 = vst [vmem:[%s205_s23] sm:$0xff] %v286_v10 }
 0x118   : > { %527 = shalt.err (!%p524_p5)
}
 0x119   : > { %s528_s11 = scalar_lea.hbm %s757_s4, 128  ;;  %s532_s8 = scalar_lea.hbm %s809_s3, 256 }
 0x11a   : > { %p529_p4 = scmp.ne.s32.totalorder %s757_s4, %s528_s11  ;;  %p533_p12 = scmp.lt.u32.totalorder %s757_s4, %s809_s3 }
 0x11b   : > { %p534_p1 = scmp.lt.u32.totalorder %s532_s8, %s528_s11  ;;  %p536_p8 = scmp.lt.u32.totalorder %s528_s11, %s757_s4 }
 0x11c   : > { %p530_p7 = pnand %p529_p4, %p817_p9 }
 0x11d   : > { %p535_p3 = por %p534_p1, %p533_p12 }
 0x11e   : > { %p531_p10 = pneg %p530_p7 }
 0x11f   : > { %p537_p11 = por %p536_p8, %p535_p3 }
 0x121   : > { %p538_p0 = pnand %p537_p11, %p531_p10 }
 0x123   : > { %541 = shalt.err (!%p538_p0)
}
 0x124   : > { %417 = dma.vmem_to_hbm [thread:$0]  (%p817_p9), %s759_s28, 128, %s757_s4, %s291_s5  }
 0x125 PF: > { %s317_s10 = sand.u32 1, %s576_s12   ;;  %p818_p6 = scmp.ne.s32.totalorder %s814_s27, 0 }
 0x126   : > { %p819_p13 = scmp.ge.s32.totalorder %s596_s17, 2  ;;  %s318_s22 = scalar_lea.sflag [#allocation4], %s317_s10 }
 0x128   : > { %p424_p2 = pnand %p819_p13, %p818_p6 }
 0x12a   : > { %571 = dma.done.wait (!%p424_p2), %s318_s22, 128  }
 0x12b   : > { %573 = vsyncadd (!%p424_p2), %s318_s22, 4294967168  ;;  %s19_s17 = sadd.s32 1, %s596_s17   ;;  %s820_s12 = smov %s580_s13 }
 0x12c   : > { %p16_p5 = scmp.ge.s32.totalorder %s19_s17, 4   ;;  %s821_s13 = smov %s584_s14 }
 0x12d   : > { %s822_s14 = smov %s682_s26  ;;  %s823_s15 = smov %s592_s16 }
 0x12e   : > { %s824_s16 = smov %s826_s20  ;;  %18 = sbr.rel (!%p16_p5) target bundleno = 6 (0x6), region = 77 }
 0x135   :  { %323 = vsyncpa [#allocation3], 1 }
 0x136   :  { %325 = vsyncpa [#allocation3 + $0x1], 1 }
 0x137   :  { %326 = vsyncpa [#allocation4], 1 }
 0x138   :  { %328 = vsyncpa [#allocation4 + $0x1], 1 }

</bundles_post_ra>
